<compile_context>
chip_gen: v5e
topology: v5e:2x2
jax: 0.10.0
libtpu: 0.0.40
codegen_flags: <defaults>
</compile_context>

<pallas_src>
import functools

import jax
import jax.numpy as jnp
from jax.experimental import pallas as pl
from jax.experimental.pallas import tpu as pltpu


def _cdiv(a, b):
    return -(-a // b)


def _rup(a, b):
    return _cdiv(a, b) * b


@functools.lru_cache(maxsize=None)
def _vmem_capacity_bytes():
    """Physical VMEM per TensorCore; conservative 64 MiB (v7x) if unknown."""
    try:
        return int(pltpu.get_tpu_info().vmem_capacity_bytes)
    except Exception:
        return 64 * 1024 * 1024


def _pick_tile_rows(H2, W2, s, g, itemsize, n_batch, budget_bytes):
    """Pick the output row-tile height TH.

    * TH is a multiple of 8 (dense sublanes, legal under the (8,128) rule) or
      TH == H2 (full extent), so TH does NOT have to divide H2.
    * Double-buffered in+out blocks plus a pessimistic estimate of the
      in-kernel relayout temporaries must fit `budget_bytes`.
    * Prefer >=4 grid steps with an even total (v7x megacore balance with
      overlap left over), then >=4, then >=2, then anything.
    """
    LANE = 128
    sub = 8 * max(1, 4 // max(1, itemsize))     # 8 f32, 16 bf16, 32 int8/fp8
    M = s * W2 * g                              # minor dim of both dense blocks

    def per_step_bytes(th):
        blk = _rup(th, sub) * _rup(M, LANE) * itemsize     # one dense (th, M) block
        io = 2 * 2 * blk                                   # in + out, double-buffered
        # Worst-case padded footprint of the in-kernel relayout intermediates
        # (th, s, W2, g) and (th, W2, s, g): narrow minor dims when C is small.
        t1 = th * s * _rup(W2, sub) * _rup(g, LANE) * itemsize
        t2 = th * W2 * _rup(s, sub) * _rup(g, LANE) * itemsize
        return io + t1 + t2

    cands = {H2} | set(range(8, H2 + 1, 8))
    fitting = sorted(t for t in cands if per_step_bytes(t) <= budget_bytes)
    if not fitting:
        fitting = [min(cands)]

    def steps(t):
        return n_batch * _cdiv(H2, t)

    for ok in (lambda t: steps(t) >= 4 and steps(t) % 2 == 0,
               lambda t: steps(t) >= 4,
               lambda t: steps(t) >= 2,
               lambda t: True):
        sel = [t for t in fitting if ok(t)]
        if sel:
            return max(sel)
    return fitting[-1]


# --------------------------------------------------------------------------- #
# Kernels
# --------------------------------------------------------------------------- #
def _contract_dense_kernel(x_ref, o_ref, *, s, w2, g):
    """Lane-dense path.  x_ref / o_ref: (1, TH, M) with M = s*w2*g.

    Input rows are ordered  [s1][w2][s2*C + c]; output rows must be ordered
    [w2][s1][s2*C + c].  One reshape / transpose / reshape relayout performs
    the (s1, w2) swap; I/O is one dense load and one dense full-width store.
    """
    th = x_ref.shape[1]
    blk = x_ref[0]                             # (TH, s*w2*g), lane-dense
    blk = blk.reshape(th, s, w2, g)            # [h2][s1][w2][r]
    blk = jnp.swapaxes(blk, 1, 2)              # [h2][w2][s1][r]
    o_ref[0] = blk.reshape(th, w2 * s * g)     # lane-dense full-block store


def _contract_concat_kernel(x_ref, o_ref, *, s):
    """Fallback (previous, known-good) path with narrow minor dims.

    x_ref: (1, TH, s, W2, s*C)   o_ref: (1, TH, W2, s*s*C)
    """
    parts = [x_ref[0, :, s1, :, :] for s1 in range(s)]    # each (TH, W2, s*C)
    o_ref[0] = jnp.concatenate(parts, axis=-1)             # (TH, W2, s*s*C)


# --------------------------------------------------------------------------- #
# Wrappers
# --------------------------------------------------------------------------- #
def _contract_nhwc_dense(x, s, th, nt, vmem_limit):
    N, H, W, C = x.shape
    H2, W2 = H // s, W // s
    g = s * C
    M = s * W2 * g                       # one output row == s input image rows

    xv = x.reshape(N, H2, M)             # metadata-only reshape (row-major split)
    out_flat = pl.pallas_call(
        functools.partial(_contract_dense_kernel, s=s, w2=W2, g=g),
        out_shape=jax.ShapeDtypeStruct((N, H2, M), x.dtype),
        grid=(N, nt),
        in_specs=[pl.BlockSpec((1, th, M), lambda n, i: (n, i, 0))],
        out_specs=pl.BlockSpec((1, th, M), lambda n, i: (n, i, 0)),
        compiler_params=pltpu.CompilerParams(
            dimension_semantics=("parallel", "parallel"),
            vmem_limit_bytes=vmem_limit),
    )(xv)
    return out_flat.reshape(N, H2, W2, s * s * C)          # metadata-only


def _contract_nhwc_concat(x, s, th, nt, vmem_limit):
    N, H, W, C = x.shape
    H2, W2 = H // s, W // s
    g = s * C

    xv = x.reshape(N, H2, s, W2, g)      # metadata-only reshape
    return pl.pallas_call(
        functools.partial(_contract_concat_kernel, s=s),
        out_shape=jax.ShapeDtypeStruct((N, H2, W2, s * s * C), x.dtype),
        grid=(N, nt),
        in_specs=[pl.BlockSpec((1, th, s, W2, g),
                               lambda n, i: (n, i, 0, 0, 0))],
        out_specs=pl.BlockSpec((1, th, W2, s * s * C),
                               lambda n, i: (n, i, 0, 0)),
        compiler_params=pltpu.CompilerParams(
            dimension_semantics=("parallel", "parallel"),
            vmem_limit_bytes=vmem_limit),
    )(xv)


def contract_nhwc(x, gain=2):
    """NHWC-native Contract: (N, H, W, C) -> (N, H//s, W//s, s*s*C).

    Output channel ordering j = s1*s*C + s2*C + c (identical to the PyTorch
    module once converted to NCHW).  No layout transposes anywhere.
    """
    N, H, W, C = x.shape
    s = int(gain)
    assert H % s == 0 and W % s == 0, "H and W must be divisible by gain"
    H2, W2 = H // s, W // s
    g = s * C
    itemsize = jnp.dtype(x.dtype).itemsize

    cap = _vmem_capacity_bytes()
    budget = (cap * 3) // 8              # 24 MiB on v7x (64 MiB), 48 MiB on v5e/v6e
    vmem_limit = (cap * 3) // 4          # 48 MiB on v7x, 96 MiB on v5e/v6e
    th = _pick_tile_rows(H2, W2, s, g, itemsize, N, budget)
    nt = _cdiv(H2, th)

    try:
        return _contract_nhwc_dense(x, s, th, nt, vmem_limit)
    except Exception:
        # Lowering-robustness fallback (narrow minor dims, no in-kernel
        # reshape); only taken if Mosaic rejects the lane-dense kernel.
        return _contract_nhwc_concat(x, s, th, nt, vmem_limit)


def contract(x, gain=2):
    """Drop-in NCHW Contract(gain).forward(x) equivalent.

    The two transposes below are XLA glue for NCHW drop-in parity only; each
    is a full extra HBM read+write, so models that keep activations NHWC
    should call `contract_nhwc` directly and pay no layout-conversion traffic.
    TODO(synk): NCHW-native in-kernel variant (stride-s lane deinterleave) to
    remove these transposes for the drop-in path as well.
    """
    N, C, H, W = x.shape
    x_nhwc = jnp.transpose(x, (0, 2, 3, 1))          # (N, H, W, C)
    y = contract_nhwc(x_nhwc, gain=gain)             # (N, H//s, W//s, s*s*C)
    return jnp.transpose(y, (0, 3, 1, 2))            # (N, C*s*s, H//s, W//s)


def contract_ref(x, gain=2):
    """Pure-JAX reference mirroring the PyTorch ops exactly (NCHW)."""
    N, C, H, W = x.shape
    s = gain
    x = x.reshape(N, C, H // s, s, W // s, s)
    x = jnp.transpose(x, (0, 3, 5, 1, 2, 4))
    return x.reshape(N, C * s * s, H // s, W // s)


if __name__ == "__main__":
    key = jax.random.PRNGKey(0)

    N, C, H, W = 2, 4, 16, 16
    gain = 2
    x = jax.random.normal(key, (N, C, H, W), dtype=jnp.float32)
    ref = contract_ref(x, gain=gain)

    # NCHW drop-in path (matches the PyTorch module bit-exactly).
    out = jax.block_until_ready(contract(x, gain=gain))
    assert out.shape == (N, C * gain * gain, H // gain, W // gain), out.shape
    assert out.dtype == x.dtype
    assert jnp.array_equal(out, ref), "Pallas Contract (NCHW path) mismatch"

    # NHWC-native path (no layout transposes anywhere).
    x_nhwc = jnp.transpose(x, (0, 2, 3, 1))
    out_nhwc = jax.block_until_ready(contract_nhwc(x_nhwc, gain=gain))
    assert jnp.array_equal(jnp.transpose(out_nhwc, (0, 3, 1, 2)), ref), \
        "Pallas Contract (NHWC path) mismatch"

    # YOLO Focus-like case (C=3) with H2 not a multiple of the tile height:
    # exercises the cdiv grid and masked edge block.
    x3 = jax.random.normal(jax.random.PRNGKey(1), (1, 3, 24, 24), jnp.float32)
    out3 = jax.block_until_ready(contract(x3, gain=2))
    assert jnp.array_equal(out3, contract_ref(x3, 2)), "C=3 edge-tile mismatch"

    # Wider-channel case: s*s*C = 128, naturally lane-dense everywhere.
    x2 = jax.random.normal(jax.random.PRNGKey(2), (1, 32, 8, 8), jnp.float32)
    out2 = jax.block_until_ready(contract(x2, gain=2))
    assert jnp.array_equal(out2, contract_ref(x2, 2)), "wide-C mismatch"

    print("KERNEL_OK")
</pallas_src>

<mosaic_0001>
module attributes {stable_mosaic.version = 11 : i64} {
  func.func @_contract_dense_kernel(%arg0: i32, %arg1: i32, %arg2: memref<1x8x128xf32, #tpu.memory_space<vmem>>, %arg3: memref<1x8x128xf32, #tpu.memory_space<vmem>>) attributes {dimension_semantics = [#tpu.dimension_semantics<parallel>, #tpu.dimension_semantics<parallel>], iteration_bounds = array<i64: 2, 1>, scalar_prefetch = 0 : i64, scratch_operands = 0 : i64, tpu.core_type = #tpu.core_type<tc>, window_params = [{transform_indices = @transform_0, window_bounds = array<i64: 1, 8, 128>}, {transform_indices = @transform_1, window_bounds = array<i64: 1, 8, 128>}]} {
    %c0 = arith.constant 0 : index
    %c0_0 = arith.constant 0 : index
    %c0_1 = arith.constant 0 : index
    %0 = vector.load %arg2[%c0, %c0_0, %c0_1] : memref<1x8x128xf32, #tpu.memory_space<vmem>>, vector<1x8x128xf32>
    %1 = vector.shape_cast %0 : vector<1x8x128xf32> to vector<8x128xf32>
    %2 = vector.shape_cast %1 : vector<8x128xf32> to vector<8x2x8x8xf32>
    %3 = tpu.transpose %2, [0, 2, 1, 3] : vector<8x2x8x8xf32> -> vector<8x8x2x8xf32>
    %4 = vector.shape_cast %3 : vector<8x8x2x8xf32> to vector<8x128xf32>
    %c0_2 = arith.constant 0 : index
    %c0_3 = arith.constant 0 : index
    %c0_4 = arith.constant 0 : index
    %5 = vector.load %arg3[%c0_2, %c0_3, %c0_4] : memref<1x8x128xf32, #tpu.memory_space<vmem>>, vector<1x8x128xf32>
    %6 = vector.shape_cast %5 : vector<1x8x128xf32> to vector<8x128xf32>
    %7 = vector.shape_cast %4 : vector<8x128xf32> to vector<1x8x128xf32>
    tpu.vector_store %arg3[%c0_2, %c0_3, %c0_4], %7 {strides = array<i32>} : memref<1x8x128xf32, #tpu.memory_space<vmem>>, vector<1x8x128xf32>,
    return
  }
  func.func @transform_0(%arg0: i32, %arg1: i32) -> (i32, i32, i32) {
    %c0_i32 = arith.constant 0 : i32
    %c0_i32_0 = arith.constant 0 : i32
    return %arg0, %arg1, %c0_i32 : i32, i32, i32
  }
  func.func @transform_1(%arg0: i32, %arg1: i32) -> (i32, i32, i32) {
    %c0_i32 = arith.constant 0 : i32
    %c0_i32_0 = arith.constant 0 : i32
    return %arg0, %arg1, %c0_i32 : i32, i32, i32
  }
}

module attributes {stable_mosaic.version = 11 : i64} {
  func.func @_contract_concat_kernel(%arg0: i32, %arg1: i32, %arg2: memref<1x8x2x8x8xf32, #tpu.memory_space<vmem>>, %arg3: memref<1x8x8x16xf32, #tpu.memory_space<vmem>>) attributes {dimension_semantics = [#tpu.dimension_semantics<parallel>, #tpu.dimension_semantics<parallel>], iteration_bounds = array<i64: 2, 1>, scalar_prefetch = 0 : i64, scratch_operands = 0 : i64, tpu.core_type = #tpu.core_type<tc>, window_params = [{transform_indices = @transform_0, window_bounds = array<i64: 1, 8, 2, 8, 8>}, {transform_indices = @transform_1, window_bounds = array<i64: 1, 8, 8, 16>}]} {
    %c0 = arith.constant 0 : index
    %c0_0 = arith.constant 0 : index
    %c0_1 = arith.constant 0 : index
    %c0_2 = arith.constant 0 : index
    %c0_3 = arith.constant 0 : index
    %0 = vector.load %arg2[%c0, %c0_0, %c0_1, %c0_2, %c0_3] : memref<1x8x2x8x8xf32, #tpu.memory_space<vmem>>, vector<1x8x1x8x8xf32>
    %1 = vector.shape_cast %0 : vector<1x8x1x8x8xf32> to vector<8x8x8xf32>
    %c0_4 = arith.constant 0 : index
    %c0_5 = arith.constant 0 : index
    %c1 = arith.constant 1 : index
    %c0_6 = arith.constant 0 : index
    %c0_7 = arith.constant 0 : index
    %2 = vector.load %arg2[%c0_4, %c0_5, %c1, %c0_6, %c0_7] : memref<1x8x2x8x8xf32, #tpu.memory_space<vmem>>, vector<1x8x1x8x8xf32>
    %3 = vector.shape_cast %2 : vector<1x8x1x8x8xf32> to vector<8x8x8xf32>
    %4 = tpu.concatenate %1, %3 in 2 : vector<8x8x8xf32>, vector<8x8x8xf32> -> vector<8x8x16xf32>
    %c0_8 = arith.constant 0 : index
    %c0_9 = arith.constant 0 : index
    %c0_10 = arith.constant 0 : index
    %c0_11 = arith.constant 0 : index
    %5 = vector.load %arg3[%c0_8, %c0_9, %c0_10, %c0_11] : memref<1x8x8x16xf32, #tpu.memory_space<vmem>>, vector<1x8x8x16xf32>
    %6 = vector.shape_cast %5 : vector<1x8x8x16xf32> to vector<8x8x16xf32>
    %7 = vector.shape_cast %4 : vector<8x8x16xf32> to vector<1x8x8x16xf32>
    tpu.vector_store %arg3[%c0_8, %c0_9, %c0_10, %c0_11], %7 {strides = array<i32>} : memref<1x8x8x16xf32, #tpu.memory_space<vmem>>, vector<1x8x8x16xf32>,
    return
  }
  func.func @transform_0(%arg0: i32, %arg1: i32) -> (i32, i32, i32, i32, i32) {
    %c0_i32 = arith.constant 0 : i32
    %c0_i32_0 = arith.constant 0 : i32
    %c0_i32_1 = arith.constant 0 : i32
    %c0_i32_2 = arith.constant 0 : i32
    return %arg0, %arg1, %c0_i32, %c0_i32_0, %c0_i32_1 : i32, i32, i32, i32, i32
  }
  func.func @transform_1(%arg0: i32, %arg1: i32) -> (i32, i32, i32, i32) {
    %c0_i32 = arith.constant 0 : i32
    %c0_i32_0 = arith.constant 0 : i32
    %c0_i32_1 = arith.constant 0 : i32
    return %arg0, %arg1, %c0_i32, %c0_i32_0 : i32, i32, i32, i32
  }
}

</mosaic_0001>

<bundles_post_ra>
// kernel: tpu_custom_call.1
= control target key start
LH: loop header
LB: loop body
LE: loop exit
PB: predicated region body
PF: predicated region fallthrough
CT: control target
= control target key end

     0   :  { %6 = vsyncpa [#allocation3], 0  ;;  %s724_s0 = inlined_call_operand.hbm [shape: f32[2,8,2,8,8], index: 0, kind: input, shape index: {}]   ;;  %s725_s1 = inlined_call_operand.hbm [shape: f32[2,8,8,16], index: 1, kind: output, shape index: {}]  }
   0x1   :  { %8 = vsyncpa [#allocation3 + $0x1], 0 }
   0x2   :  { %9 = vsyncpa [#allocation4], 0 }
   0x3   :  { %11 = vsyncpa [#allocation4 + $0x1], 0  ;;  %s549_s6 = smov 0   ;;  %s551_s7 = smov 0  }
   0x4   :  { %s553_s8 = smov 0   ;;  %s555_s9 = smov 0  }
   0x5   :  { %s557_s10 = smov 0   ;;  %s559_s11 = smov 0  }
   0x6 LB: > { %s330_s12 = sadd.s32 4294967295, %s533_s11   ;;  %s331_s13 = sadd.s32 4294967294, %s533_s11   ;;  %s533_s11 = sphi %s559_s11, %s17_s11   ;;  %s529_s10 = sphi %s557_s10, %s734_s10   ;;  %s525_s9 = sphi %s555_s9, %s733_s9   ;;  %s521_s8 = sphi %s553_s8, %s732_s8   ;;  %s517_s7 = sphi %s551_s7, %s731_s7   ;;  %s513_s6 = sphi %s549_s6, %s730_s6  }
   0x7   : > { %s29_s14 = sadd.s32 1, %s529_s10  ;;  %s38_s15 = sadd.s32 1, %s521_s8 }
   0x8   : > { %p31_p0 = scmp.ge.s32.totalorder %s29_s14, 2  ;;  %p45_p1 = scmp.ne.s32.totalorder %s521_s8, %s517_s7 }
   0x9   : > { %p46_p2 = scmp.eq.s32.totalorder %s533_s11, 0  ;;  %p51_p3 = scmp.ne.s32.totalorder %s517_s7, %s513_s6 }
   0xa   : > { %s736_s14 = smov (%p31_p0, %s29_s14), 0  ;;  %p52_p5 = scmp.eq.s32.totalorder %s330_s12, 0 }
   0xb   : > { %p590_p4 = por %p46_p2, %p45_p1  ;;  %s33_s17 = ssub.s32 %s529_s10, %s736_s14 }
   0xc   : > { %p77_p6 = scmp.eq.s32.totalorder %s330_s12, 1  ;;  %p36_p7 = scmp.eq.s32.totalorder %s33_s17, 0 }
   0xd   : > { %p596_p8 = por %p52_p5, %p51_p3  ;;  %p83_p10 = scmp.eq.s32.totalorder %s331_s13, 1 }
   0xe   : > { %p600_p9 = por %p77_p6, %p45_p1  ;;  %p333_p12 = scmp.ge.s32.totalorder %s533_s11, 2 }
   0xf   : > { %s605_s20 = scalar_select %p36_p7, %s521_s8, %s38_s15  }
  0x10   : > { %p607_p11 = por %p83_p10, %p51_p3  ;;  %p367_p13 = scmp.lt.s32.totalorder %s533_s11, 2 }
  0x11   : > { %s103_s22 = sand.u32 1, %s521_s8   ;;  %s353_s24 = sshll.u32 %s529_s10, 7 }
  0x12   : > { %s334_s23 = sshll.u32 %s103_s22, 7  ;;  %s115_s27 = scalar_lea.hbm %s724_s0, %s353_s24 }
  0x13   : > { %s107_s28 = scalar_lea.vmem [#allocation2], %s334_s23  ;;  %s116_s30 = sshll.u32 %s115_s27, 4  ;;  %s117_s30 = int_to_ptr.hbm [resolvable:$true] %s116_s30 }
  0x14   : > { %s118_s29 = sshll.u32 %s107_s28, 4  ;;  %p360_p0 = pnand %p367_p13, %p590_p4  ;;  %s119_s29 = int_to_ptr.vmem [resolvable:$true] %s118_s29 }
  0x15   : > { %p337_p1 = scmp.ge.s32.totalorder %s533_s11, 1  ;;  %s104_s2 = scalar_lea.sflag [#allocation3], %s103_s22 }
  0x16   : > { %s535_s3 = smov 128   ;;  %s536_s4 = smov 8  }
  0x17   : > { %362 = dma.hbm_to_vmem [thread:$0]  (!%p360_p0), %s117_s30, 2048, %s119_s29, %s104_s2, %s535_s3, %s535_s3, %s536_s4  }
  0x18   : > { %p126_p2 = scmp.lt.s32.totalorder %s533_s11, 3 }
  0x1a   : > { %p127_p3 = pnand %p337_p1, %p126_p2 }
  0x1b   : > { %s623_s5 = sand.u32 (!%p127_p3), 1, %s517_s7  }
  0x1c   : > { %130 = sbr.rel (%p127_p3) target bundleno = 172 (0xac), region = 24  ;;  %s338_s12 = sshll.u32 (!%p127_p3), %s623_s5, 7 }
  0x1d   : > { %s133_s13 = scalar_lea.sflag (!%p127_p3), [#allocation3], %s623_s5  ;;  %s627_s15 = scalar_lea.vmem (!%p127_p3), [#allocation2], %s338_s12 }
  0x21   : > { %504 = dma.done.wait (%p596_p8), %s133_s13, 2048  }
  0x22   : > { %506 = vsyncadd (%p596_p8), %s133_s13, 4294965248  ;;  %v342_v0 = vld [vmem:[%s627_s15 + $0x28] sm:$0xff]  ;;  %s537_s16 = smov 8   ;;  %v343_v3 = vld [vmem:[%s627_s15 + $0x38] sm:$0xff]  ;;  %s339_s17 = sshll.u32 %s623_s5, 6  ;;  %vm207_vm0 = vcmask 64512  }
  0x23   : > { %v340_v1 = vld [vmem:[%s627_s15 + $0x8] sm:$0xff]  ;;  %187 = vrot.lane.b32.xlu1 %v342_v0, %s537_s16  ;;  %v341_v4 = vld [vmem:[%s627_s15 + $0x18] sm:$0xff]  ;;  %v162_v8 = vld [vmem:[%s627_s15 + $0x40] sm:$0xff]  ;;  %vm216_vm1 = vcmask 130048   ;;  %s652_s18 = scalar_lea.vmem [#allocation5], %s339_s17  ;;  %s354_s22 = sshll.u32 %s525_s9, 6 }
  0x24   : > { %183 = vrot.lane.b32.xlu0 %v340_v1, %s537_s16  ;;  %v344_v2 = vld [vmem:[%s627_s15 + $0x48] sm:$0xff]  ;;  %v345_v5 = vld [vmem:[%s627_s15 + $0x58] sm:$0xff]  ;;  %v163_v11 = vld [vmem:[%s627_s15 + $0x50] sm:$0xff]  ;;  %s239_s25 = scalar_lea.hbm %s725_s1, %s354_s22  ;;  %s240_s26 = sshll.u32 %s652_s18, 4  ;;  %s241_s26 = int_to_ptr.vmem [resolvable:$true] %s240_s26 }
  0x25   : > { %191 = vrot.lane.b32.xlu2 %v344_v2, %s537_s16  ;;  %v347_v6 = vld [vmem:[%s627_s15 + $0x78] sm:$0xff]  ;;  %v346_v7 = vld [vmem:[%s627_s15 + $0x68] sm:$0xff]  ;;  %v160_v14 = vld [vmem:[%s627_s15 + $0x20] sm:$0xff]  ;;  %s242_s9 = sshll.u32 %s239_s25, 4  ;;  %s226_s27 = scalar_lea.sflag [#allocation4], %s623_s5  ;;  %s243_s9 = int_to_ptr.hbm [resolvable:$true] %s242_s9 }
  0x26   : > { %v158_v15 = vld [vmem:[%s627_s15] sm:$0xff]  ;;  %v161_v20 = vld [vmem:[%s627_s15 + $0x30] sm:$0xff]  ;;  %s465_s28 = sshra.s32 %s243_s9, 4  ;;  %s471_s3 = scalar_lea.hbm %s725_s1, 128  ;;  %s466_s28 = int_to_ptr.hbm [resolvable:$true] %s465_s28 }
  0x27   : > { %v159_v21 = vld [vmem:[%s627_s15 + $0x10] sm:$0xff]  ;;  %v164_v27 = vld [vmem:[%s627_s15 + $0x60] sm:$0xff]  ;;  %s467_s29 = scalar_lea.hbm %s466_s28, 64  ;;  %p472_p7 = scmp.lt.s32.totalorder %s466_s28, %s725_s1 }
  0x28   : > { %v165_v26 = vld [vmem:[%s627_s15 + $0x70] sm:$0xff]  ;;  %p468_p4 = scmp.ne.s32.totalorder %s466_s28, %s467_s29  ;;  %p473_p8 = scmp.lt.s32.totalorder %s471_s3, %s467_s29 }
  0x2a   : > { %p469_p5 = pnand %p468_p4, %p600_p9  ;;  %p474_p10 = por %p473_p8, %p472_p7 }
  0x2b   : > { %189 = vrot.lane.b32.xlu1 %v343_v3, %s537_s16 }
  0x2c   : > { %185 = vrot.lane.b32.xlu0 %v341_v4, %s537_s16  ;;  %p470_p6 = pneg %p469_p5 }
  0x2d   : > { %193 = vrot.lane.b32.xlu2 %v345_v5, %s537_s16 }
  0x2e   : > { %p475_p13 = pnand %p474_p10, %p470_p6 }
  0x33   : > { %197 = vrot.lane.b32.xlu1 %v347_v6, %s537_s16 }
  0x34   : > { %195 = vrot.lane.b32.xlu0 %v346_v7, %s537_s16 }
  0x7f   : > { %v192_v9 = vpop.permute.xlu2 %191 }
  0x80   : > { %v212_v10 = vsel %vm207_vm0, %v162_v8, %v192_v9 }
  0x81   : > { %221 = vst.msk [vmem:[%s652_s18 + $0x20] sm:$0xff] %vm216_vm1, %v212_v10 }
  0x87   : > { %v194_v12 = vpop.permute.xlu2 %193 }
  0x88   : > { %v213_v13 = vsel %vm207_vm0, %v163_v11, %v194_v12 }
  0x89   : > { %222 = vst.msk [vmem:[%s652_s18 + $0x28] sm:$0xff] %vm216_vm1, %v213_v13 }
  0x95   : > { %v188_v16 = vpop.permute.xlu1 %187 }
  0x96   : > { %v184_v17 = vpop.permute.xlu0 %183  ;;  %v210_v18 = vsel %vm207_vm0, %v160_v14, %v188_v16 }
  0x97   : > { %v208_v19 = vsel %vm207_vm0, %v158_v15, %v184_v17  ;;  %219 = vst.msk [vmem:[%s652_s18 + $0x10] sm:$0xff] %vm216_vm1, %v210_v18 }
  0x98   : > { %217 = vst.msk [vmem:[%s652_s18] sm:$0xff] %vm216_vm1, %v208_v19 }
  0x9d   : > { %v190_v22 = vpop.permute.xlu1 %189 }
  0x9e   : > { %v186_v23 = vpop.permute.xlu0 %185  ;;  %v211_v24 = vsel %vm207_vm0, %v161_v20, %v190_v22 }
  0x9f   : > { %v209_v25 = vsel %vm207_vm0, %v159_v21, %v186_v23  ;;  %220 = vst.msk [vmem:[%s652_s18 + $0x18] sm:$0xff] %vm216_vm1, %v211_v24 }
  0xa0   : > { %218 = vst.msk [vmem:[%s652_s18 + $0x8] sm:$0xff] %vm216_vm1, %v209_v25 }
  0xa5   : > { %v198_v28 = vpop.permute.xlu1 %197 }
  0xa6   : > { %v196_v29 = vpop.permute.xlu0 %195  ;;  %v215_v30 = vsel %vm207_vm0, %v165_v26, %v198_v28 }
  0xa7   : > { %v214_v31 = vsel %vm207_vm0, %v164_v27, %v196_v29  ;;  %224 = vst.msk [vmem:[%s652_s18 + $0x38] sm:$0xff] %vm216_vm1, %v215_v30 }
  0xa8   : > { %223 = vst.msk [vmem:[%s652_s18 + $0x30] sm:$0xff] %vm216_vm1, %v214_v31 }
  0xa9   : > { %478 = shalt.err (!%p475_p13)
}
  0xaa   : > { %s538_s5 = smov 128  }
  0xab   : > { %357 = dma.vmem_to_hbm [thread:$0]  (%p600_p9), %s241_s26, 1024, %s243_s9, %s226_s27, %s538_s5, %s538_s5, %s537_s16  }
  0xac PF: > { %s257_s13 = sand.u32 1, %s513_s6   ;;  %p364_p0 = pnand %p333_p12, %p607_p11 }
  0xad   : > { %s258_s15 = scalar_lea.sflag [#allocation4], %s257_s13 }
  0xae   : > { %p365_p1 = pneg %p364_p0 }
  0xb0   : > { %508 = dma.done.wait (%p365_p1), %s258_s15, 1024  }
  0xb1   : > { %510 = vsyncadd (%p365_p1), %s258_s15, 4294966272  ;;  %s17_s11 = sadd.s32 1, %s533_s11   ;;  %s730_s6 = smov %s517_s7 }
  0xb2   : > { %p14_p2 = scmp.ge.s32.totalorder %s17_s11, 4   ;;  %s731_s7 = smov %s521_s8 }
  0xb3   : > { %s732_s8 = smov %s605_s20  ;;  %s733_s9 = smov %s529_s10 }
  0xb4   : > { %s734_s10 = smov %s736_s14  ;;  %16 = sbr.rel (!%p14_p2) target bundleno = 6 (0x6), region = 70 }
  0xb9   :  { %264 = vsyncpa [#allocation3], 1 }
  0xba   :  { %266 = vsyncpa [#allocation3 + $0x1], 1 }
  0xbb   :  { %267 = vsyncpa [#allocation4], 1 }
  0xbc   :  { %269 = vsyncpa [#allocation4 + $0x1], 1 }

</bundles_post_ra>
